<compile_context>
chip_gen: v5e
topology: v5e:2x2
jax: 0.10.0
libtpu: 0.0.40
codegen_flags: <defaults>
</compile_context>

<pallas_src>
import functools
import math

import jax
import jax.numpy as jnp
from jax.experimental import pallas as pl
from jax.experimental.pallas import tpu as pltpu


def _round_up(x, m):
    return ((x + m - 1) // m) * m


# ---------------------------------------------------------------------------
# Kernel helpers
# ---------------------------------------------------------------------------
def _affine(x_bf16, h_bf16, wih, whh, b):
    """fused = x @ W_ih + h_full @ W_hh_full + b   (f32 accumulation)."""
    fused = jnp.dot(x_bf16, wih, preferred_element_type=jnp.float32)
    fused = fused + jnp.dot(h_bf16, whh, preferred_element_type=jnp.float32)
    return fused + b


def _logsoftmax_slab(fused, is_hidden, is_logit):
    """Build the (B_pad, F_pad) output slab:
       cols [0,H) = raw affine (new hidden), cols [H,H+O) = log-softmax,
       remaining padding cols = finite don't-care values."""
    masked = jnp.where(is_logit, fused, -jnp.inf)
    m = jnp.max(masked, axis=-1, keepdims=True)
    p = jnp.exp(masked - m)                        # zeros outside logit cols
    lse = jnp.log(jnp.sum(p, axis=-1, keepdims=True))
    logsm = (fused - m) - lse
    return jnp.where(is_hidden, fused, logsm)


# ---------------------------------------------------------------------------
# Kernels
# ---------------------------------------------------------------------------
def _rnn_cell_kernel(x_ref, h_ref, wih_ref, whh_ref, b_ref, out_ref,
                     *, hidden_size, output_size):
    B_pad, F_pad = out_ref.shape
    col = jax.lax.broadcasted_iota(jnp.int32, (B_pad, F_pad), 1)
    is_hidden = col < hidden_size
    is_logit = jnp.logical_and(col >= hidden_size, col < hidden_size + output_size)

    fused = _affine(x_ref[...], h_ref[...], wih_ref[...], whh_ref[...], b_ref[...])
    out_ref[...] = _logsoftmax_slab(fused, is_hidden, is_logit).astype(out_ref.dtype)


def _rnn_seq_kernel(x_ref, h0_ref, wih_ref, whh_ref, b_ref, out_ref, h_scratch,
                    *, hidden_size, output_size, steps_per_block):
    @pl.when(pl.program_id(0) == 0)
    def _():
        h_scratch[...] = h0_ref[...]               # hidden carry resident in VMEM

    _, B_pad, F_pad = out_ref.shape

    # Hoisted constants (loaded / materialized once per grid iteration).
    wih = wih_ref[...]
    whh = whh_ref[...]
    b = b_ref[...]
    col = jax.lax.broadcasted_iota(jnp.int32, (B_pad, F_pad), 1)
    is_hidden = col < hidden_size
    is_logit = jnp.logical_and(col >= hidden_size, col < hidden_size + output_size)

    def step(t, carry):
        x = x_ref[t]                               # (B_pad, I) bf16
        h = h_scratch[...]                         # (B_pad, F_pad) bf16, full lane width
        fused = _affine(x, h, wih, whh, b)
        # Carry FIRST, from the pre-softmax affine result: next step's matmul
        # does not wait on the EUP/XLU log-softmax chain. Full-lane unmasked
        # store; the zero rows of W_hh_full kill the logit/padding lanes.
        h_scratch[...] = fused.astype(jnp.bfloat16)
        out_ref[t] = _logsoftmax_slab(fused, is_hidden, is_logit).astype(out_ref.dtype)
        return carry

    jax.lax.fori_loop(0, steps_per_block, step, 0, unroll=True)


# ---------------------------------------------------------------------------
# Parameter preparation
# ---------------------------------------------------------------------------
def prepare_params(w_i2h, b_i2h, w_i2o, b_i2o, input_size):
    """Fuse + pad the two Linear layers for the kernels.

    w_i2h: (I+H, H), b_i2h: (1, H), w_i2o: (I+H, O), b_i2o: (1, O)
    Returns:
      W_ih      (I, F_pad)     bf16
      W_hh_full (F_pad, F_pad) bf16  -- rows [0,H) hold the recurrent weights,
                                        rows [H,F_pad) are zero so the full
                                        128-lane carried slab can be used as
                                        the recurrent matmul operand.
      b         (1, F_pad)     f32
    with F_pad = round_up(H + O, 128).
    """
    _, H = w_i2h.shape
    O = w_i2o.shape[1]
    F = H + O
    F_pad = _round_up(F, 128)
    w = jnp.concatenate([w_i2h, w_i2o], axis=1)                 # (I+H, H+O)
    w = jnp.pad(w, ((0, 0), (0, F_pad - F)))                    # (I+H, F_pad)
    w_ih = w[:input_size].astype(jnp.bfloat16)                  # (I, F_pad)
    w_hh_full = jnp.zeros((F_pad, F_pad), jnp.float32).at[:H].set(w[input_size:])
    w_hh_full = w_hh_full.astype(jnp.bfloat16)                  # (F_pad, F_pad)
    b = jnp.concatenate([b_i2h, b_i2o], axis=1)
    b = jnp.pad(b, ((0, 0), (0, F_pad - F))).astype(jnp.float32)
    return w_ih, w_hh_full, b


# ---------------------------------------------------------------------------
# Wrappers
# ---------------------------------------------------------------------------
@functools.partial(jax.jit, static_argnames=("hidden_size", "output_size"))
def rnn_forward(x, h, w_ih, w_hh, b, *, hidden_size, output_size):
    """Single RNN step (== RNN.forward). x: (B, I), h: (B, H).
    Returns (log_softmax_output (B, O), new_hidden (B, H))."""
    B, I = x.shape
    H, O = hidden_size, output_size
    F_pad = w_ih.shape[1]
    B_pad = _round_up(max(B, 16), 16)        # bf16 packs 2 rows/sublane -> 16-row tile

    x_p = jnp.zeros((B_pad, I), jnp.bfloat16).at[:B].set(x.astype(jnp.bfloat16))
    h_p = jnp.zeros((B_pad, F_pad), jnp.bfloat16).at[:B, :H].set(h.astype(jnp.bfloat16))

    full = lambda shape: pl.BlockSpec(shape, lambda: (0,) * len(shape))
    slab = pl.pallas_call(
        functools.partial(_rnn_cell_kernel, hidden_size=H, output_size=O),
        out_shape=jax.ShapeDtypeStruct((B_pad, F_pad), jnp.float32),
        in_specs=[full((B_pad, I)), full((B_pad, F_pad)),
                  full((I, F_pad)), full((F_pad, F_pad)), full((1, F_pad))],
        out_specs=full((B_pad, F_pad)),
    )(x_p, h_p, w_ih, w_hh, b)

    output = slab[:B, H:H + O]
    hidden = slab[:B, :H]
    return output, hidden


@functools.partial(jax.jit,
                   static_argnames=("hidden_size", "output_size", "steps_per_block"))
def rnn_forward_sequence(xs, h0, w_ih, w_hh, b, *, hidden_size, output_size,
                         steps_per_block=8):
    """Run the RNN cell over a (T, B, I) sequence in ONE pallas_call.

    The grid iterates over time BLOCKS of `steps_per_block` steps ("arbitrary",
    serial recurrence); the hidden state lives in a bf16 VMEM scratch slab at
    full 128-lane width; weights/bias use constant index_maps so they are
    DMA'd from HBM exactly once. Returns (per-step log-softmax (T, B, O),
    final hidden (B, H))."""
    T, B, I = xs.shape
    H, O = hidden_size, output_size
    F_pad = w_ih.shape[1]
    B_pad = _round_up(max(B, 16), 16)
    TT = min(steps_per_block, T)             # demo T=6 -> single grid point
    n_blocks = pl.cdiv(T, TT)
    T_pad = n_blocks * TT

    xs_p = jnp.zeros((T_pad, B_pad, I), jnp.bfloat16).at[:T, :B].set(
        xs.astype(jnp.bfloat16))
    h0_p = jnp.zeros((B_pad, F_pad), jnp.bfloat16).at[:B, :H].set(
        h0.astype(jnp.bfloat16))

    grid_spec = pltpu.PrefetchScalarGridSpec(
        num_scalar_prefetch=0,
        grid=(n_blocks,),
        in_specs=[
            pl.BlockSpec((TT, B_pad, I), lambda tb: (tb, 0, 0)),    # time-blocked x
            pl.BlockSpec((B_pad, F_pad), lambda tb: (0, 0)),        # h0 (used at tb==0)
            pl.BlockSpec((I, F_pad), lambda tb: (0, 0)),            # weights resident
            pl.BlockSpec((F_pad, F_pad), lambda tb: (0, 0)),
            pl.BlockSpec((1, F_pad), lambda tb: (0, 0)),
        ],
        out_specs=pl.BlockSpec((TT, B_pad, F_pad), lambda tb: (tb, 0, 0)),
        scratch_shapes=[pltpu.VMEM((B_pad, F_pad), jnp.bfloat16)],  # full-width carry
    )
    slabs = pl.pallas_call(
        functools.partial(_rnn_seq_kernel, hidden_size=H, output_size=O,
                          steps_per_block=TT),
        out_shape=jax.ShapeDtypeStruct((T_pad, B_pad, F_pad), jnp.bfloat16),
        grid_spec=grid_spec,
        compiler_params=pltpu.CompilerParams(
            dimension_semantics=("arbitrary",),        # time recurrence is serial
            vmem_limit_bytes=32 * 1024 * 1024),        # fits v7x's 64 MiB budget
    )(xs_p, h0_p, w_ih, w_hh, b)

    outputs = slabs[:T, :B, H:H + O].astype(jnp.float32)            # (T, B, O)
    hidden = slabs[T - 1, :B, :H].astype(jnp.float32)               # (B, H)
    return outputs, hidden


# ---------------------------------------------------------------------------
# Init + pure-JAX reference
# ---------------------------------------------------------------------------
def init_params(key, input_size, hidden_size, output_size):
    """PyTorch-style nn.Linear init: U(-1/sqrt(fan_in), +1/sqrt(fan_in)).
    Weights stored transposed vs PyTorch, i.e. (in_features, out_features)."""
    fan_in = input_size + hidden_size
    bound = 1.0 / math.sqrt(fan_in)
    k1, k2, k3, k4 = jax.random.split(key, 4)
    w_i2h = jax.random.uniform(k1, (fan_in, hidden_size), jnp.float32, -bound, bound)
    b_i2h = jax.random.uniform(k2, (1, hidden_size), jnp.float32, -bound, bound)
    w_i2o = jax.random.uniform(k3, (fan_in, output_size), jnp.float32, -bound, bound)
    b_i2o = jax.random.uniform(k4, (1, output_size), jnp.float32, -bound, bound)
    return w_i2h, b_i2h, w_i2o, b_i2o


def _ref_cell(x, h, w_ih, w_hh_full, b, H, O):
    """Reference step with the same bf16 operand quantization as the kernel."""
    xb = x.astype(jnp.bfloat16).astype(jnp.float32)
    hb = h.astype(jnp.bfloat16).astype(jnp.float32)
    fused = (xb @ w_ih.astype(jnp.float32)
             + hb @ w_hh_full[:H].astype(jnp.float32) + b)
    hid = fused[:, :H]
    out = jax.nn.log_softmax(fused[:, H:H + O], axis=1)
    return out, hid


if __name__ == "__main__":
    input_size, hidden_size, output_size = 16, 32, 8
    batch, seq_len = 2, 6

    key = jax.random.PRNGKey(0)
    kp, kx, ks = jax.random.split(key, 3)
    w_i2h, b_i2h, w_i2o, b_i2o = init_params(kp, input_size, hidden_size, output_size)
    w_ih, w_hh, b = prepare_params(w_i2h, b_i2h, w_i2o, b_i2o, input_size)

    x = jax.random.normal(kx, (batch, input_size), jnp.float32)
    h0 = jnp.zeros((batch, hidden_size), jnp.float32)   # like init_hidden, per row

    # ---- single step (matches RNN.forward) ----
    out, hid = rnn_forward(x, h0, w_ih, w_hh, b,
                           hidden_size=hidden_size, output_size=output_size)
    jax.block_until_ready((out, hid))

    ref_out, ref_hid = _ref_cell(x, h0, w_ih, w_hh, b, hidden_size, output_size)
    assert out.shape == (batch, output_size)
    assert hid.shape == (batch, hidden_size)
    assert bool(jnp.max(jnp.abs(out - ref_out)) < 1e-2)
    assert bool(jnp.max(jnp.abs(hid - ref_hid)) < 1e-2)
    assert bool(jnp.all(jnp.abs(jnp.sum(jnp.exp(out), axis=1) - 1.0) < 1e-3))

    # ---- full sequence: time-blocked recurrence inside one kernel ----
    xs = jax.random.normal(ks, (seq_len, batch, input_size), jnp.float32)
    outs, hT = rnn_forward_sequence(xs, h0, w_ih, w_hh, b,
                                    hidden_size=hidden_size,
                                    output_size=output_size)
    jax.block_until_ready((outs, hT))

    ref_outs = []
    rh = h0
    for t in range(seq_len):
        ro, rh = _ref_cell(xs[t], rh, w_ih, w_hh, b, hidden_size, output_size)
        ref_outs.append(ro)
    ref_outs = jnp.stack(ref_outs)
    assert outs.shape == (seq_len, batch, output_size)
    assert hT.shape == (batch, hidden_size)
    # Sequence slab is stored in bf16 -> compare against the f32 reference with
    # a tolerance that covers one bf16 ulp at these magnitudes.
    assert bool(jnp.max(jnp.abs(outs - ref_outs)) < 3e-2)
    assert bool(jnp.max(jnp.abs(hT - rh)) < 3e-2)
    assert bool(jnp.all(jnp.abs(jnp.sum(jnp.exp(outs), axis=-1) - 1.0) < 3e-2))

    print("KERNEL_OK")
</pallas_src>

<mosaic_0001>
module attributes {stable_mosaic.version = 11 : i64} {
  func.func @_rnn_cell_kernel(%arg0: memref<16x16xbf16, #tpu.memory_space<vmem>>, %arg1: memref<16x128xbf16, #tpu.memory_space<vmem>>, %arg2: memref<16x128xbf16, #tpu.memory_space<vmem>>, %arg3: memref<128x128xbf16, #tpu.memory_space<vmem>>, %arg4: memref<1x128xf32, #tpu.memory_space<vmem>>, %arg5: memref<16x128xf32, #tpu.memory_space<vmem>>) attributes {dimension_semantics = [], scalar_prefetch = 0 : i64, scratch_operands = 0 : i64, tpu.core_type = #tpu.core_type<tc>} {
    %0 = tpu.iota {dimensions = array<i32: 1>} : vector<16x128xi32>
    %c32_i32 = arith.constant 32 : i32
    %1 = vector.broadcast %c32_i32 : i32 to vector<16x128xi32>
    %2 = arith.cmpi slt, %0, %1 : vector<16x128xi32>
    %c32_i32_0 = arith.constant 32 : i32
    %3 = vector.broadcast %c32_i32_0 : i32 to vector<16x128xi32>
    %4 = arith.cmpi sge, %0, %3 : vector<16x128xi32>
    %c40_i32 = arith.constant 40 : i32
    %5 = vector.broadcast %c40_i32 : i32 to vector<16x128xi32>
    %6 = arith.cmpi slt, %0, %5 : vector<16x128xi32>
    %7 = arith.andi %4, %6 : vector<16x128xi1>
    %c0 = arith.constant 0 : index
    %c0_1 = arith.constant 0 : index
    %8 = vector.load %arg0[%c0, %c0_1] : memref<16x16xbf16, #tpu.memory_space<vmem>>, vector<16x16xbf16>
    %c0_2 = arith.constant 0 : index
    %c0_3 = arith.constant 0 : index
    %9 = vector.load %arg1[%c0_2, %c0_3] : memref<16x128xbf16, #tpu.memory_space<vmem>>, vector<16x128xbf16>
    %c0_4 = arith.constant 0 : index
    %c0_5 = arith.constant 0 : index
    %10 = vector.load %arg2[%c0_4, %c0_5] : memref<16x128xbf16, #tpu.memory_space<vmem>>, vector<16x128xbf16>
    %c0_6 = arith.constant 0 : index
    %c0_7 = arith.constant 0 : index
    %11 = vector.load %arg3[%c0_6, %c0_7] : memref<128x128xbf16, #tpu.memory_space<vmem>>, vector<128x128xbf16>
    %c0_8 = arith.constant 0 : index
    %c0_9 = arith.constant 0 : index
    %12 = vector.load %arg4[%c0_8, %c0_9] : memref<1x128xf32, #tpu.memory_space<vmem>>, vector<1x128xf32>
    %cst = arith.constant dense<0.000000e+00> : vector<16x128xf32>
    %13 = tpu.matmul %8, %10, %cst {dimension_numbers = #tpu.dot_dimension_numbers<[1], [0], [0], [1], [0, 0, 1, 1], [], []>} : vector<16x16xbf16>, vector<16x128xbf16>, vector<16x128xf32> -> vector<16x128xf32>
    %cst_10 = arith.constant dense<0.000000e+00> : vector<16x128xf32>
    %14 = tpu.matmul %9, %11, %cst_10 {dimension_numbers = #tpu.dot_dimension_numbers<[1], [0], [0], [1], [0, 0, 1, 1], [], []>} : vector<16x128xbf16>, vector<128x128xbf16>, vector<16x128xf32> -> vector<16x128xf32>
    %15 = arith.addf %13, %14 : vector<16x128xf32>
    %16 = vector.broadcast %12 : vector<1x128xf32> to vector<16x128xf32>
    %17 = arith.addf %15, %16 : vector<16x128xf32>
    %cst_11 = arith.constant 0xFF800000 : f32
    %18 = vector.broadcast %cst_11 : f32 to vector<16x128xf32>
    %19 = arith.select %7, %17, %18 : vector<16x128xi1>, vector<16x128xf32>
    %cst_12 = arith.constant dense<0xFF800000> : vector<16xf32>
    %20 = vector.multi_reduction <maximumf>, %19, %cst_12 [1] : vector<16x128xf32> to vector<16xf32>
    %21 = vector.shape_cast %20 : vector<16xf32> to vector<16x1xf32>
    %22 = vector.broadcast %21 : vector<16x1xf32> to vector<16x128xf32>
    %23 = arith.subf %19, %22 : vector<16x128xf32>
    %24 = math.exp %23 : vector<16x128xf32>
    %cst_13 = arith.constant dense<0.000000e+00> : vector<16xf32>
    %25 = vector.multi_reduction <add>, %24, %cst_13 [1] : vector<16x128xf32> to vector<16xf32>
    %26 = vector.shape_cast %25 : vector<16xf32> to vector<16x1xf32>
    %27 = math.log %26 : vector<16x1xf32>
    %28 = vector.broadcast %21 : vector<16x1xf32> to vector<16x128xf32>
    %29 = arith.subf %17, %28 : vector<16x128xf32>
    %30 = vector.broadcast %27 : vector<16x1xf32> to vector<16x128xf32>
    %31 = arith.subf %29, %30 : vector<16x128xf32>
    %32 = arith.select %2, %17, %31 : vector<16x128xi1>, vector<16x128xf32>
    %c0_14 = arith.constant 0 : index
    %c0_15 = arith.constant 0 : index
    %33 = vector.load %arg5[%c0_14, %c0_15] : memref<16x128xf32, #tpu.memory_space<vmem>>, vector<16x128xf32>
    tpu.vector_store %arg5[%c0_14, %c0_15], %32 {strides = array<i32>} : memref<16x128xf32, #tpu.memory_space<vmem>>, vector<16x128xf32>,
    return
  }
}

</mosaic_0001>

<bundles_post_ra>
// kernel: rnn_forward.1
= control target key start
LH: loop header
LB: loop body
LE: loop exit
PB: predicated region body
PF: predicated region fallthrough
CT: control target
= control target key end

     0   :  { %10 = vsyncpa [#allocation3], 0  ;;  %s295_s21 = smov [#allocation2]   ;;  %s296_s23 = smov 64   ;;  %s349_s0 = inlined_call_operand.vmem [shape: bf16[16,16], index: 0, kind: input, shape index: {}]   ;;  %s350_s1 = inlined_call_operand.vmem [shape: bf16[16,128], index: 1, kind: input, shape index: {}]   ;;  %s351_s2 = inlined_call_operand.vmem [shape: bf16[16,128], index: 2, kind: input, shape index: {}]   ;;  %s352_s3 = inlined_call_operand.hbm [shape: bf16[128,128], index: 3, kind: input, shape index: {}]   ;;  %s353_s4 = inlined_call_operand.vmem [shape: f32[1,128], index: 4, kind: input, shape index: {}]   ;;  %s354_s5 = inlined_call_operand.vmem [shape: f32[16,128], index: 5, kind: output, shape index: {}]  }
   0x1   :  { %s21_s20 = sshll.u32 %s352_s3, 4  ;;  %s23_s22 = sshll.u32 %s295_s21, 4  ;;  %s22_s20 = int_to_ptr.hbm [resolvable:$true] %s21_s20  ;;  %s24_s22 = int_to_ptr.vmem [resolvable:$true] %s23_s22 }
   0x2   :  { %s297_s24 = smov 4  }
   0x3   :  { %29 = dma.hbm_to_vmem [thread:$0]  %s22_s20, 1024, %s24_s22, [#allocation3], %s296_s23, %s296_s23, %s297_s24  }
   0x4   :  { %293 = dma.done.wait [#allocation3], 1024  }
   0x5   :  { %294 = vsyncadd [#allocation3], 4294966272  ;;  %v256_v0 = vld [vmem:[#allocation2 + $0x38] sm:$0xff]  ;;  %v255_v1 = vld [vmem:[#allocation2 + $0x30] sm:$0xff]  ;;  %vm145_vm0 = vcmask 130048   ;;  %v37_v11 = vlaneseq }
   0x6   :  { %120 = vmatpush.bf16.msra.mxu0 %v256_v0  ;;  %v248_v2 = vld [vmem:[%s351_s2] sm:$0xff]  ;;  %v254_v4 = vld [vmem:[#allocation2 + $0x28] sm:$0xff]  ;;  %v252_v6 = vld [vmem:[#allocation2 + $0x18] sm:$0xff] }
   0x7   :  { %v246_v3 = vld [vmem:[%s349_s0] sm:$0xff]  ;;  %156 = vmatpush.bf16.msra.mxu1 %v248_v2  ;;  %v251_v7 = vld [vmem:[#allocation2 + $0x10] sm:$0xff]  ;;  %v250_v8 = vld [vmem:[#allocation2 + $0x8] sm:$0xff]  ;;  %v38_v12 = vand.u32 127, %v37_v11 }
   0x8   :  { %v253_v5 = vld [vmem:[#allocation2 + $0x20] sm:$0xff] }
   0x9   :  { %v249_v9 = vld [vmem:[#allocation2] sm:$0xff]  ;;  %vm40_vm1 = vcmp.ge.s32.totalorder %v38_v12, 32  ;;  %vm41_vm2 = vcmp.lt.s32.totalorder %v38_v12, 40  ;;  %vm39_vm4 = vcmp.lt.s32.totalorder %v38_v12, 32 }
   0xa   :  { %121 = vmatpush.bf16.msra.mxu0 %v255_v1  ;;  %245 = vmatmul.msk.bf16.vlgmr.msra.gmra.mxu1 %vm145_vm0, %v246_v3  ;;  %v247_v10 = vld [vmem:[%s350_s1] sm:$0xff]  ;;  %vm42_vm3 = vmand %vm40_vm1, %vm41_vm2 }
   0xb   :  { %v260_v14 = vld [vmem:[%s353_s4] ss:$0 sm:$0xff] }
   0xe   :  { %122 = vmatpush.bf16.msra.mxu0 %v254_v4 }
  0x12   :  { %123 = vmatpush.bf16.msra.mxu0 %v253_v5 }
  0x16   :  { %124 = vmatpush.bf16.msra.mxu0 %v252_v6 }
  0x1a   :  { %125 = vmatpush.bf16.msra.mxu0 %v251_v7 }
  0x1e   :  { %126 = vmatpush.bf16.msra.mxu0 %v250_v8 }
  0x22   :  { %127 = vmatpush.bf16.msra.mxu0 %v249_v9 }
  0x25   :  { %128 = vmatmul.bf16.vlgmr.msra.gmra.mxu0 %v247_v10 }
  0x87   :  { %v158_v13 = vpop.f32.mrf.mxu1 }
  0x8f   :  { %v160_v19 = vpop.f32.mrf.mxu1 }
  0xa2   :  { %v129_v15 = vpop.f32.mrf.mxu0 }
  0xa3   :  { %v159_v16 = vadd.f32 %v158_v13, %v129_v15 }
  0xa5   :  { %v166_v17 = vadd.f32 %v260_v14, %v159_v16 }
  0xa7   :  { %v168_v18 = vsel %vm42_vm3, %v166_v17, -inf }
  0xa8   :  { %170 = vmax.xlane.f32.xlu0 %v168_v18 }
  0xaa   :  { %v131_v20 = vpop.f32.mrf.mxu0 }
  0xab   :  { %v161_v21 = vadd.f32 %v160_v19, %v131_v20 }
  0xad   :  { %v167_v22 = vadd.f32 %v260_v14, %v161_v21 }
  0xaf   :  { %v169_v23 = vsel %vm42_vm3, %v167_v22, -inf }
  0xb0   :  { %172 = vmax.xlane.f32.xlu0 %v169_v23 }
 0x11b   :  { %v171_v24 = vpop.xlane.xlu0 %170 }
 0x11c   :  { %v174_v25 = vsub.f32 %v168_v18, %v171_v24  ;;  %v188_v34 = vsub.f32 %v166_v17, %v171_v24 }
 0x11e   :  { %v176_v26 = vmul.f32 1.442695, %v174_v25 }
 0x120   :  { %261 = vpow2.f32 %v176_v26 }
 0x123   :  { %v173_v27 = vpop.xlane.xlu0 %172 }
 0x124   :  { %v175_v28 = vsub.f32 %v169_v23, %v173_v27  ;;  %v189_v40 = vsub.f32 %v167_v22, %v173_v27 }
 0x126   :  { %v262_v29 = vpop.eup %261  ;;  %v178_v30 = vmul.f32 1.442695, %v175_v28 }
 0x127   :  { %180 = vadd.xlane.f32.xlu1 %v262_v29 }
 0x128   :  { %263 = vpow2.f32 %v178_v30 }
 0x12e   :  { %v264_v31 = vpop.eup %263 }
 0x12f   :  { %182 = vadd.xlane.f32.xlu1 %v264_v31 }
 0x19a   :  { %v181_v32 = vpop.xlane.xlu1 %180 }
 0x19b   :  { %265 = vlog2.f32 %v181_v32 }
 0x1a1   :  { %v266_v33 = vpop.eup %265 }
 0x1a2   :  { %v185_v35 = vmul.f32 0.6931472, %v266_v33  ;;  %v183_v36 = vpop.xlane.xlu1 %182 }
 0x1a3   :  { %267 = vlog2.f32 %v183_v36 }
 0x1a4   :  { %v190_v37 = vsub.f32 %v188_v34, %v185_v35 }
 0x1a6   :  { %v192_v38 = vsel %vm39_vm4, %v166_v17, %v190_v37 }
 0x1a7   :  { %194 = vst [vmem:[%s354_s5] sm:$0xff] %v192_v38 }
 0x1a9   :  { %v268_v39 = vpop.eup %267 }
 0x1aa   :  { %v187_v41 = vmul.f32 0.6931472, %v268_v39 }
 0x1ac   :  { %v191_v42 = vsub.f32 %v189_v40, %v187_v41 }
 0x1ae   :  { %v193_v43 = vsel %vm39_vm4, %v167_v22, %v191_v42 }
 0x1af   :  { %195 = vst [vmem:[%s354_s5 + $0x8] sm:$0xff] %v193_v43 }
 0x1b0   :  { %200 = vsyncpa [#allocation3], 1 }

</bundles_post_ra>
